<compile_context>
chip_gen: v5e
topology: v5e:2x2
jax: 0.10.0
libtpu: 0.0.40
codegen_flags: <defaults>
</compile_context>

<pallas_src>
import functools

import jax
import jax.numpy as jnp
from jax.experimental import pallas as pl
from jax.experimental.pallas import tpu as pltpu


# ---------------------------------------------------------------------------
# Kernels
# ---------------------------------------------------------------------------
def _residual_mlp_kernel(x_ref, w1_ref, b1_ref, w2_ref, b2_ref, o_ref):
    # Fully-resident-weight path.
    # x_ref: (tm, Dp)  w1_ref: (Dp, Hp) bf16  b1_ref: (1, Hp) f32
    # w2_ref: (Hp, Dp) bf16  b2_ref: (1, Dp) f32  o_ref: (tm, Dp)
    xb = x_ref[...].astype(jnp.bfloat16)                      # MXU operand
    h = jnp.dot(xb, w1_ref[...], preferred_element_type=jnp.float32)
    h = jax.nn.gelu(h + b1_ref[...], approximate=True)        # tanh GELU (EUP)
    y = jnp.dot(h.astype(jnp.bfloat16), w2_ref[...],
                preferred_element_type=jnp.float32)
    y = y + b2_ref[...]
    # Residual: re-read x from its pipeline buffer (no f32 copy kept live
    # across both matmuls).
    o_ref[...] = (y + x_ref[...].astype(jnp.float32)).astype(o_ref.dtype)


def _residual_mlp_split_kernel(x_ref, w1_ref, b1_ref, w2_ref, b2_ref, o_ref,
                               acc_ref):
    # Hidden-dim-split path (large Swin stages on v7x): grid = (rows, Hp//tk).
    # x_ref: (tm, Dp)  w1_ref: (Dp, tk)  b1_ref: (1, tk)
    # w2_ref: (tk, Dp)  b2_ref: (1, Dp)  acc_ref: (tm, Dp) f32 scratch
    k = pl.program_id(1)

    @pl.when(k == 0)
    def _():
        acc_ref[...] = jnp.zeros_like(acc_ref)

    xb = x_ref[...].astype(jnp.bfloat16)
    h = jnp.dot(xb, w1_ref[...], preferred_element_type=jnp.float32)
    h = jax.nn.gelu(h + b1_ref[...], approximate=True)
    acc_ref[...] += jnp.dot(h.astype(jnp.bfloat16), w2_ref[...],
                            preferred_element_type=jnp.float32)

    @pl.when(k == pl.num_programs(1) - 1)
    def _():
        o_ref[...] = (acc_ref[...] + b2_ref[...]
                      + x_ref[...].astype(jnp.float32)).astype(o_ref.dtype)


# ---------------------------------------------------------------------------
# Helpers / wrapper
# ---------------------------------------------------------------------------
def _round_up(v, m):
    return (v + m - 1) // m * m


@functools.lru_cache(maxsize=None)
def _vmem_limit_bytes():
    """VMEM budget: physical capacity minus headroom, capped at 120 MiB."""
    try:
        cap = int(pltpu.get_tpu_info().vmem_capacity_bytes)
    except Exception:  # conservative fallback (v7x per-TC size)
        cap = 64 * 1024 * 1024
    return max(32 * 1024 * 1024,
               min(cap - 8 * 1024 * 1024, 120 * 1024 * 1024))


def prepare_mlp_params(w1, b1, w2, b2):
    """Pad feature dims to multiples of 128 and cast weights to bf16.

    Call ONCE at model-load time (not per forward call) — padded entries are
    zero, which keeps the padded-K/N math exact.
    """
    D, H = w1.shape
    Dp, Hp = _round_up(D, 128), _round_up(H, 128)
    w1p = jnp.pad(w1, ((0, Dp - D), (0, Hp - H))).astype(jnp.bfloat16)
    b1p = jnp.pad(jnp.reshape(b1, (1, H)), ((0, 0), (0, Hp - H))).astype(
        jnp.float32)
    w2p = jnp.pad(w2, ((0, Hp - H), (0, Dp - D))).astype(jnp.bfloat16)
    b2p = jnp.pad(jnp.reshape(b2, (1, D)), ((0, 0), (0, Dp - D))).astype(
        jnp.float32)
    return w1p, b1p, w2p, b2p


@functools.partial(jax.jit, static_argnames=("tm", "force_split"))
def residual_mlp(x, w1p, b1p, w2p, b2p, *, tm=256, force_split=False):
    """fn(x) + x with fn = Linear(D,H) -> GELU -> Linear(H,D).

    x: (B, N, D) f32 or bf16.  w1p/b1p/w2p/b2p come from prepare_mlp_params.
    Returns (B, N, D) with x's dtype.
    """
    B, N, D = x.shape
    Dp, Hp = w1p.shape
    assert Dp >= D and Dp % 128 == 0 and Hp % 128 == 0
    M = B * N

    # Row tile: big enough to amortize per-step overhead / fill the MXU, but
    # clamped so the row grid has >=2 steps when possible (v7x megacore) and
    # stays a multiple of 8.
    cap = _round_up(max(pl.cdiv(M, 2), 8), 8)
    tm = max(8, min(tm, cap))
    grid_m = pl.cdiv(M, tm)          # ragged last block handled by Pallas

    x2 = x.reshape(M, D)
    if Dp != D:
        # K padding must be zero (padded W1 rows are zero too) -> exact math;
        # padded output columns come out 0 and are sliced away below.
        x2 = jnp.pad(x2, ((0, 0), (0, Dp - D)))

    itemsize = jnp.dtype(x.dtype).itemsize
    vmem_limit = _vmem_limit_bytes()
    resident_bytes = (
        2 * Dp * Hp * 2 + (Hp + Dp) * 4        # bf16 weights (Buffered(1)) + biases
        + 2 * 2 * tm * Dp * itemsize           # x / out double buffers
        + tm * Hp * 6 + tm * Dp * 4)           # h (f32 + bf16 copy) + y temp
    use_split = force_split or resident_bytes > int(0.7 * vmem_limit)

    flops = 4 * M * Dp * Hp
    transcendentals = M * Hp
    bytes_accessed = 2 * M * Dp * itemsize + 2 * Dp * Hp * 2 + (Hp + Dp) * 4
    cost = pl.CostEstimate(flops=flops, transcendentals=transcendentals,
                           bytes_accessed=bytes_accessed)

    if not use_split:
        out2 = pl.pallas_call(
            _residual_mlp_kernel,
            out_shape=jax.ShapeDtypeStruct((M, Dp), x.dtype),
            grid_spec=pltpu.PrefetchScalarGridSpec(
                num_scalar_prefetch=0,
                grid=(grid_m,),
                in_specs=[
                    pl.BlockSpec((tm, Dp), lambda i: (i, 0)),          # x tile
                    pl.BlockSpec((Dp, Hp), lambda i: (0, 0),           # W1
                                 pipeline_mode=pl.Buffered(1)),
                    pl.BlockSpec((1, Hp), lambda i: (0, 0),            # b1
                                 pipeline_mode=pl.Buffered(1)),
                    pl.BlockSpec((Hp, Dp), lambda i: (0, 0),           # W2
                                 pipeline_mode=pl.Buffered(1)),
                    pl.BlockSpec((1, Dp), lambda i: (0, 0),            # b2
                                 pipeline_mode=pl.Buffered(1)),
                ],
                out_specs=pl.BlockSpec((tm, Dp), lambda i: (i, 0)),
            ),
            compiler_params=pltpu.CompilerParams(
                dimension_semantics=("parallel",),
                vmem_limit_bytes=vmem_limit),
            cost_estimate=cost,
        )(x2, w1p, b1p, w2p, b2p)
    else:
        # Hidden-dim split: caps VMEM independent of H.
        tk = next(c for c in (1024, 512, 256, 128) if Hp % c == 0)
        grid_k = Hp // tk
        out2 = pl.pallas_call(
            _residual_mlp_split_kernel,
            out_shape=jax.ShapeDtypeStruct((M, Dp), x.dtype),
            grid_spec=pltpu.PrefetchScalarGridSpec(
                num_scalar_prefetch=0,
                grid=(grid_m, grid_k),
                in_specs=[
                    pl.BlockSpec((tm, Dp), lambda i, k: (i, 0)),       # x tile
                    pl.BlockSpec((Dp, tk), lambda i, k: (0, k)),       # W1 blk
                    pl.BlockSpec((1, tk), lambda i, k: (0, k)),        # b1 blk
                    pl.BlockSpec((tk, Dp), lambda i, k: (k, 0)),       # W2 blk
                    pl.BlockSpec((1, Dp), lambda i, k: (0, 0),         # b2
                                 pipeline_mode=pl.Buffered(1)),
                ],
                out_specs=pl.BlockSpec((tm, Dp), lambda i, k: (i, 0)),
                scratch_shapes=[pltpu.VMEM((tm, Dp), jnp.float32)],
            ),
            compiler_params=pltpu.CompilerParams(
                dimension_semantics=("parallel", "arbitrary"),
                vmem_limit_bytes=vmem_limit),
            cost_estimate=cost,
        )(x2, w1p, b1p, w2p, b2p)

    if Dp != D:
        out2 = out2[:, :D]
    return out2.reshape(B, N, D)


def _reference(x, w1, b1, w2, b2):
    # Same tanh-GELU / f32 math as the kernel target (kernel additionally uses
    # bf16 MXU operands, hence the loosened tolerance below).
    h = jax.nn.gelu(x @ w1 + b1[0], approximate=True)
    return h @ w2 + b2[0] + x


# TODO(synk): Residual wraps an arbitrary fn in PyTorch; only the canonical
# Swin MLP instantiation is fused here — other fns would need their own kernel.

if __name__ == "__main__":
    # Small shapes consistent with a Swin block: batch=2, tokens=8, dim=32.
    B, N, D, H = 2, 8, 32, 64

    key = jax.random.PRNGKey(0)
    kx, k1, k2, k3, k4 = jax.random.split(key, 5)

    x = jax.random.normal(kx, (B, N, D), dtype=jnp.float32)
    w1 = jax.random.normal(k1, (D, H), dtype=jnp.float32) * (1.0 / D ** 0.5)
    b1 = jax.random.normal(k2, (1, H), dtype=jnp.float32) * 0.01
    w2 = jax.random.normal(k3, (H, D), dtype=jnp.float32) * (1.0 / H ** 0.5)
    b2 = jax.random.normal(k4, (1, D), dtype=jnp.float32) * 0.01

    # Weight prep happens once, at "model-load" time.
    params = prepare_mlp_params(w1, b1, w2, b2)

    ref = _reference(x, w1, b1, w2, b2)

    # Path A: fully-resident weights (the common Swin case).
    out = jax.block_until_ready(residual_mlp(x, *params))
    assert out.shape == x.shape and out.dtype == x.dtype
    assert jnp.allclose(out, ref, atol=2e-2, rtol=2e-2), float(
        jnp.max(jnp.abs(out - ref)))

    # Path B: hidden-dim-split accumulator path (used for the largest stages).
    out_s = jax.block_until_ready(residual_mlp(x, *params, force_split=True))
    assert out_s.shape == x.shape and out_s.dtype == x.dtype
    assert jnp.allclose(out_s, ref, atol=2e-2, rtol=2e-2), float(
        jnp.max(jnp.abs(out_s - ref)))

    print("KERNEL_OK")
</pallas_src>

<mosaic_0001>
module attributes {stable_mosaic.version = 11 : i64} {
  func.func @_residual_mlp_kernel(%arg0: i32, %arg1: memref<8x128xf32, #tpu.memory_space<vmem>>, %arg2: memref<128x128xbf16, #tpu.memory_space<vmem>>, %arg3: memref<1x128xf32, #tpu.memory_space<vmem>>, %arg4: memref<128x128xbf16, #tpu.memory_space<vmem>>, %arg5: memref<1x128xf32, #tpu.memory_space<vmem>>, %arg6: memref<8x128xf32, #tpu.memory_space<vmem>>) attributes {dimension_semantics = [#tpu.dimension_semantics<parallel>], iteration_bounds = array<i64: 2>, scalar_prefetch = 0 : i64, scratch_operands = 0 : i64, tpu.core_type = #tpu.core_type<tc>, window_params = [{transform_indices = @transform_0, window_bounds = array<i64: 8, 128>}, {pipeline_mode = #tpu.pipeline_mode<synchronous>, transform_indices = @transform_1, window_bounds = array<i64: 128, 128>}, {pipeline_mode = #tpu.pipeline_mode<synchronous>, transform_indices = @transform_2, window_bounds = array<i64: 1, 128>}, {pipeline_mode = #tpu.pipeline_mode<synchronous>, transform_indices = @transform_3, window_bounds = array<i64: 128, 128>}, {pipeline_mode = #tpu.pipeline_mode<synchronous>, transform_indices = @transform_4, window_bounds = array<i64: 1, 128>}, {transform_indices = @transform_5, window_bounds = array<i64: 8, 128>}]} {
    %c0 = arith.constant 0 : index
    %c0_0 = arith.constant 0 : index
    %0 = vector.load %arg1[%c0, %c0_0] : memref<8x128xf32, #tpu.memory_space<vmem>>, vector<8x128xf32>
    %1 = arith.truncf %0 : vector<8x128xf32> to vector<8x128xbf16>
    %c0_1 = arith.constant 0 : index
    %c0_2 = arith.constant 0 : index
    %2 = vector.load %arg2[%c0_1, %c0_2] : memref<128x128xbf16, #tpu.memory_space<vmem>>, vector<128x128xbf16>
    %cst = arith.constant dense<0.000000e+00> : vector<8x128xf32>
    %3 = tpu.matmul %1, %2, %cst {dimension_numbers = #tpu.dot_dimension_numbers<[1], [0], [0], [1], [0, 0, 1, 1], [], []>} : vector<8x128xbf16>, vector<128x128xbf16>, vector<8x128xf32> -> vector<8x128xf32>
    %c0_3 = arith.constant 0 : index
    %c0_4 = arith.constant 0 : index
    %4 = vector.load %arg3[%c0_3, %c0_4] : memref<1x128xf32, #tpu.memory_space<vmem>>, vector<1x128xf32>
    %5 = vector.broadcast %4 : vector<1x128xf32> to vector<8x128xf32>
    %6 = arith.addf %3, %5 : vector<8x128xf32>
    %7 = arith.mulf %6, %6 : vector<8x128xf32>
    %8 = arith.mulf %6, %7 : vector<8x128xf32>
    %cst_5 = arith.constant 4.471500e-02 : f32
    %9 = vector.broadcast %cst_5 : f32 to vector<8x128xf32>
    %10 = arith.mulf %9, %8 : vector<8x128xf32>
    %11 = arith.addf %6, %10 : vector<8x128xf32>
    %cst_6 = arith.constant 0.797884583 : f32
    %12 = vector.broadcast %cst_6 : f32 to vector<8x128xf32>
    %13 = arith.mulf %12, %11 : vector<8x128xf32>
    %14 = math.tanh %13 : vector<8x128xf32>
    %cst_7 = arith.constant 1.000000e+00 : f32
    %15 = vector.broadcast %cst_7 : f32 to vector<8x128xf32>
    %16 = arith.addf %15, %14 : vector<8x128xf32>
    %cst_8 = arith.constant 5.000000e-01 : f32
    %17 = vector.broadcast %cst_8 : f32 to vector<8x128xf32>
    %18 = arith.mulf %17, %16 : vector<8x128xf32>
    %19 = arith.mulf %6, %18 : vector<8x128xf32>
    %20 = arith.truncf %19 : vector<8x128xf32> to vector<8x128xbf16>
    %c0_9 = arith.constant 0 : index
    %c0_10 = arith.constant 0 : index
    %21 = vector.load %arg4[%c0_9, %c0_10] : memref<128x128xbf16, #tpu.memory_space<vmem>>, vector<128x128xbf16>
    %cst_11 = arith.constant dense<0.000000e+00> : vector<8x128xf32>
    %22 = tpu.matmul %20, %21, %cst_11 {dimension_numbers = #tpu.dot_dimension_numbers<[1], [0], [0], [1], [0, 0, 1, 1], [], []>} : vector<8x128xbf16>, vector<128x128xbf16>, vector<8x128xf32> -> vector<8x128xf32>
    %c0_12 = arith.constant 0 : index
    %c0_13 = arith.constant 0 : index
    %23 = vector.load %arg5[%c0_12, %c0_13] : memref<1x128xf32, #tpu.memory_space<vmem>>, vector<1x128xf32>
    %24 = vector.broadcast %23 : vector<1x128xf32> to vector<8x128xf32>
    %25 = arith.addf %22, %24 : vector<8x128xf32>
    %c0_14 = arith.constant 0 : index
    %c0_15 = arith.constant 0 : index
    %26 = vector.load %arg1[%c0_14, %c0_15] : memref<8x128xf32, #tpu.memory_space<vmem>>, vector<8x128xf32>
    %27 = arith.addf %25, %26 : vector<8x128xf32>
    %c0_16 = arith.constant 0 : index
    %c0_17 = arith.constant 0 : index
    %28 = vector.load %arg6[%c0_16, %c0_17] : memref<8x128xf32, #tpu.memory_space<vmem>>, vector<8x128xf32>
    tpu.vector_store %arg6[%c0_16, %c0_17], %27 {strides = array<i32>} : memref<8x128xf32, #tpu.memory_space<vmem>>, vector<8x128xf32>,
    return
  }
  func.func @transform_0(%arg0: i32) -> (i32, i32) {
    %c0_i32 = arith.constant 0 : i32
    %c0_i32_0 = arith.constant 0 : i32
    return %arg0, %c0_i32 : i32, i32
  }
  func.func @transform_1(%arg0: i32) -> (i32, i32) {
    %c0_i32 = arith.constant 0 : i32
    %c0_i32_0 = arith.constant 0 : i32
    %c0_i32_1 = arith.constant 0 : i32
    return %c0_i32, %c0_i32_0 : i32, i32
  }
  func.func @transform_2(%arg0: i32) -> (i32, i32) {
    %c0_i32 = arith.constant 0 : i32
    %c0_i32_0 = arith.constant 0 : i32
    %c0_i32_1 = arith.constant 0 : i32
    return %c0_i32, %c0_i32_0 : i32, i32
  }
  func.func @transform_3(%arg0: i32) -> (i32, i32) {
    %c0_i32 = arith.constant 0 : i32
    %c0_i32_0 = arith.constant 0 : i32
    %c0_i32_1 = arith.constant 0 : i32
    return %c0_i32, %c0_i32_0 : i32, i32
  }
  func.func @transform_4(%arg0: i32) -> (i32, i32) {
    %c0_i32 = arith.constant 0 : i32
    %c0_i32_0 = arith.constant 0 : i32
    %c0_i32_1 = arith.constant 0 : i32
    return %c0_i32, %c0_i32_0 : i32, i32
  }
  func.func @transform_5(%arg0: i32) -> (i32, i32) {
    %c0_i32 = arith.constant 0 : i32
    %c0_i32_0 = arith.constant 0 : i32
    return %arg0, %c0_i32 : i32, i32
  }
}

</mosaic_0001>

<bundles_post_ra>
// kernel: residual_mlp.1
= control target key start
LH: loop header
LB: loop body
LE: loop exit
PB: predicated region body
PF: predicated region fallthrough
CT: control target
= control target key end

     0   :  { %10 = vsyncpa [#allocation3], 0  ;;  %s802_s0 = inlined_call_operand.vmem [shape: f32[16,128], index: 0, kind: input, shape index: {}]   ;;  %s803_s1 = inlined_call_operand.hbm [shape: bf16[128,128], index: 1, kind: input, shape index: {}]   ;;  %s804_s2 = inlined_call_operand.vmem [shape: f32[1,128], index: 2, kind: input, shape index: {}]   ;;  %s805_s3 = inlined_call_operand.hbm [shape: bf16[128,128], index: 3, kind: input, shape index: {}]   ;;  %s806_s4 = inlined_call_operand.vmem [shape: f32[1,128], index: 4, kind: input, shape index: {}]   ;;  %s807_s5 = inlined_call_operand.vmem [shape: f32[16,128], index: 5, kind: output, shape index: {}]  }
   0x1   :  { %11 = vsyncpa [#allocation5], 0  ;;  %s743_s18 = smov 0  }
   0x2 LB: > { %s169_s21 = sshll.u32 %s803_s1, 4  ;;  %s752_s22 = sadd.s32 4294967295, %s707_s18   ;;  %s707_s18 = sphi %s743_s18, %s17_s18   ;;  %s170_s21 = int_to_ptr.hbm [resolvable:$true] %s169_s21 }
   0x3   : > { %p507_p0 = scmp.ge.s32.totalorder %s707_s18, 1  ;;  %p158_p1 = scmp.lt.s32.totalorder %s707_s18, 3 }
   0x4   : > { %p613_p2 = scmp.eq.s32.totalorder %s752_s22, 0  ;;  %s709_s24 = smov [#allocation2]  }
   0x5   : > { %p757_p3 = pnand %p507_p0, %p158_p1  ;;  %s171_s25 = sshll.u32 %s709_s24, 4  ;;  %s172_s25 = int_to_ptr.vmem [resolvable:$true] %s171_s25 }
   0x6   : > { %s186_s28 = sshll.u32 %s805_s3, 4  ;;  %s710_s29 = smov [#allocation4]   ;;  %s187_s28 = int_to_ptr.hbm [resolvable:$true] %s186_s28 }
   0x7   : > { %p606_p4 = pneg %p757_p3  ;;  %s188_s30 = sshll.u32 %s710_s29, 4  ;;  %s189_s30 = int_to_ptr.vmem [resolvable:$true] %s188_s30 }
   0x8   : > { %s711_s6 = smov 64   ;;  %s712_s7 = smov 4  }
   0x9   : > { %p607_p5 = pnand %p613_p2, %p606_p4  ;;  %214 = sbr.rel (%p757_p3) target bundleno = 336 (0x150), region = 40 }
   0xb   : > { %609 = dma.hbm_to_vmem [thread:$0]  (!%p607_p5), %s170_s21, 1024, %s172_s25, [#allocation3], %s711_s6, %s711_s6, %s712_s7  }
   0xc   : > { %612 = dma.hbm_to_vmem [thread:$0]  (!%p607_p5), %s187_s28, 1024, %s189_s30, [#allocation5], %s711_s6, %s711_s6, %s712_s7  }
   0xe   : > { %698 = dma.done.wait (%p613_p2), [#allocation3], 1024  }
   0xf   : > { %700 = vsyncadd (%p613_p2), [#allocation3], 4294966272 }
  0x10   : > { %702 = dma.done.wait (%p613_p2), [#allocation5], 1024  }
  0x11   : > { %704 = vsyncadd (%p613_p2), [#allocation5], 4294966272  ;;  %v589_v0 = vld [vmem:[#allocation2 + $0x38] sm:$0xff]  ;;  %v588_v1 = vld [vmem:[#allocation2 + $0x30] sm:$0xff]  ;;  %p246_p6 = scmp.lt.s32.totalorder %s752_s22, 1 }
  0x12   : > { %324 = vmatpush.bf16.msra.mxu0 %v589_v0  ;;  %v597_v2 = vld [vmem:[#allocation4 + $0x38] sm:$0xff]  ;;  %v587_v3 = vld [vmem:[#allocation2 + $0x28] sm:$0xff]  ;;  %v586_v4 = vld [vmem:[#allocation2 + $0x20] sm:$0xff] }
  0x13   : > { %415 = vmatpush.bf16.msra.mxu1 %v597_v2  ;;  %v585_v5 = vld [vmem:[#allocation2 + $0x18] sm:$0xff]  ;;  %s810_s22 = smov (!%p246_p6, %s752_s22), 1  ;;  %v584_v6 = vld [vmem:[#allocation2 + $0x10] sm:$0xff]  ;;  %v583_v7 = vld [vmem:[#allocation2 + $0x8] sm:$0xff] }
  0x14   : > { %s514_s8 = sshll.u32 %s810_s22, 3  ;;  %v582_v8 = vld [vmem:[#allocation2] sm:$0xff]  ;;  %v596_v11 = vld [vmem:[#allocation4 + $0x30] sm:$0xff]  ;;  %v595_v12 = vld [vmem:[#allocation4 + $0x28] sm:$0xff] }
  0x15   : > { %s249_s11 = scalar_lea.vmem %s802_s0, %s514_s8  ;;  %v594_v13 = vld [vmem:[#allocation4 + $0x20] sm:$0xff]  ;;  %v593_v14 = vld [vmem:[#allocation4 + $0x18] sm:$0xff]  ;;  %v592_v15 = vld [vmem:[#allocation4 + $0x10] sm:$0xff]  ;;  %s253_s19 = scalar_lea.vmem %s807_s5, %s514_s8 }
  0x16   : > { %325 = vmatpush.bf16.msra.mxu0 %v588_v1  ;;  %v254_v9 = vld [vmem:[%s249_s11] sm:$0xff]  ;;  %v591_v16 = vld [vmem:[#allocation4 + $0x8] sm:$0xff] }
  0x17   : > { %v255_v10 = vpack.c.bf16 %v254_v9, %v254_v9  ;;  %416 = vmatpush.bf16.msra.mxu1 %v596_v11  ;;  %v590_v17 = vld [vmem:[#allocation4] sm:$0xff] }
  0x18   : > { %v629_v18 = vld [vmem:[%s804_s2] ss:$0 sm:$0xff] }
  0x19   : > { %v630_v32 = vld [vmem:[%s806_s4] ss:$0 sm:$0xff] }
  0x1a   : > { %326 = vmatpush.bf16.msra.mxu0 %v587_v3 }
  0x1b   : > { %417 = vmatpush.bf16.msra.mxu1 %v595_v12 }
  0x1e   : > { %327 = vmatpush.bf16.msra.mxu0 %v586_v4 }
  0x1f   : > { %418 = vmatpush.bf16.msra.mxu1 %v594_v13 }
  0x22   : > { %328 = vmatpush.bf16.msra.mxu0 %v585_v5 }
  0x23   : > { %419 = vmatpush.bf16.msra.mxu1 %v593_v14 }
  0x26   : > { %329 = vmatpush.bf16.msra.mxu0 %v584_v6 }
  0x27   : > { %420 = vmatpush.bf16.msra.mxu1 %v592_v15 }
  0x2a   : > { %330 = vmatpush.bf16.msra.mxu0 %v583_v7 }
  0x2b   : > { %421 = vmatpush.bf16.msra.mxu1 %v591_v16 }
  0x2e   : > { %331 = vmatpush.bf16.msra.mxu0 %v582_v8 }
  0x2f   : > { %422 = vmatpush.bf16.msra.mxu1 %v590_v17 }
  0x31   : > { %332 = vmatmul.bf16.vlgmr.msra.gmra.mxu0 %v255_v10 }
  0xae   : > { %v333_v19 = vpop.f32.mrf.mxu0 }
  0xaf   : > { %v334_v20 = vadd.f32 %v629_v18, %v333_v19 }
  0xb1   : > { %v337_v21 = vmul.f32 %v334_v20, %v334_v20 }
  0xb3   : > { %v338_v22 = vmul.f32 %v337_v21, %v334_v20 }
  0xb5   : > { %v339_v23 = vmul.f32 0.044715, %v338_v22 }
  0xb6   : > { %v335_v24 = vpop.f32.mrf.mxu0 }
  0xb7   : > { %v340_v25 = vadd.f32 %v339_v23, %v334_v20 }
  0xb9   : > { %v341_v26 = vmul.f32 0.7978846, %v340_v25 }
  0xbb   : > { %631 = vtanh.f32 %v341_v26 }
  0xc1   : > { %v632_v27 = vpop.eup %631 }
  0xc2   : > { %v343_v28 = vadd.f32 1.0, %v632_v27 }
  0xc4   : > { %v344_v29 = vmul.f32 0.5, %v343_v28 }
  0xc6   : > { %v345_v30 = vmul.f32 %v344_v29, %v334_v20 }
  0xc8   : > { %v346_v31 = vpack.c.bf16 %v345_v30, %v345_v30 }
  0xca   : > { %423 = vmatmul.bf16.vlgmr.msra.gmra.mxu1 %v346_v31 }
 0x147   : > { %v424_v33 = vpop.f32.mrf.mxu1 }
 0x148   : > { %v425_v34 = vadd.f32 %v630_v32, %v424_v33 }
 0x14a   : > { %v428_v35 = vadd.f32 %v425_v34, %v254_v9 }
 0x14c   : > { %429 = vst [vmem:[%s253_s19] sm:$0xff] %v428_v35 }
 0x14f   : > { %v426_v36 = vpop.f32.mrf.mxu1 }
 0x150 PF: > { %s17_s18 = sadd.s32 1, %s707_s18  }
 0x151   : > { %p14_p7 = scmp.ge.s32.totalorder %s17_s18, 4  }
 0x153   :  { %16 = sbr.rel (!%p14_p7) target bundleno = 2 (0x2), region = 79 }
 0x158   :  { %449 = vsyncpa [#allocation3], 1 }
 0x159   :  { %451 = vsyncpa [#allocation3 + $0x1], 1 }
 0x15a   :  { %452 = vsyncpa [#allocation5], 1 }

</bundles_post_ra>
